<compile_context>
chip_gen: v7x
topology: tpu7x:2x2x1
jax: 0.10.0
libtpu: 0.0.40
codegen_flags: <defaults>
</compile_context>

<pallas_src>
import functools

import jax
import jax.numpy as jnp
from jax.experimental import pallas as pl
from jax.experimental.pallas import tpu as pltpu


def bilinear_matrix(out_size: int, in_size: int) -> jnp.ndarray:
    """Interpolation matrix A (out_size, in_size) for 1-D bilinear resize,
    matching torch F.interpolate(mode='bilinear', align_corners=False)."""
    i = jnp.arange(out_size, dtype=jnp.float32)
    scale = in_size / out_size
    src = (i + 0.5) * scale - 0.5
    src = jnp.maximum(src, 0.0)                      # torch clamps negative source coords to 0
    i0 = jnp.floor(src).astype(jnp.int32)
    i0 = jnp.minimum(i0, in_size - 1)
    i1 = jnp.minimum(i0 + 1, in_size - 1)
    l1 = src - i0.astype(jnp.float32)
    l0 = 1.0 - l1
    rows = jnp.arange(out_size)
    A = jnp.zeros((out_size, in_size), jnp.float32)
    A = A.at[rows, i0].add(l0)
    A = A.at[rows, i1].add(l1)
    return A


def _largest_divisor_leq(n: int, cap: int, multiple_of: int = 1) -> int:
    """Largest divisor of n that is <= cap and a multiple of `multiple_of`; falls back to n."""
    cap = max(1, min(n, cap))
    for d in range(cap, 0, -1):
        if n % d == 0 and d % multiple_of == 0:
            return d
    return n


def seg_loss_kernel(xh_ref, gt_ref, awt_ref, out_ref, *, pos_weight, acc_rows, bf16_eup):
    """One grid step = a (B, tile_H, W) slab: width-interp dot + folded BCE + VPU accumulate."""
    n = pl.program_id(1)
    ht = pl.program_id(2)

    @pl.when(jnp.logical_and(n == 0, ht == 0))
    def _():
        out_ref[...] = jnp.zeros_like(out_ref)

    xh = xh_ref[...]                              # (B, tH, w) f32: height-interpolated logits
    B, tH, w = xh.shape
    awt = awt_ref[...]                            # (w, W)  f32 width-interp matrix (transposed)
    W = awt.shape[1]

    # Width interpolation: one lane-dense 2-D MXU dot for the whole slab (batch+rows in M dim).
    x = jnp.dot(xh.reshape(B * tH, w), awt,
                preferred_element_type=jnp.float32)            # (B*tH, W)

    # gt arrives int8/uint8/f32; cast to f32 only once it is in VMEM.
    y = gt_ref[...].astype(jnp.float32).reshape(B * tH, W)

    # Numerically-stable softplus(-x); optionally push exp/log1p through the bf16 EUP path
    # (v6e/v7x only, ~1e-3 relative error; keep off on v5e).
    neg_abs = -jnp.abs(x)
    if bf16_eup:
        t = jnp.log1p(jnp.exp(neg_abs.astype(jnp.bfloat16))).astype(jnp.float32)
    else:
        t = jnp.log1p(jnp.exp(neg_abs))
    sp = jnp.maximum(-x, 0.0) + t                 # softplus(-x)

    # Folded BCE-with-logits + pos_weight (the trailing /pos_weight and the mean are a single
    # wrapper-side scale):  loss = x + sp + y*((pw-1)*sp - x)
    loss = x + sp + y * ((pos_weight - 1.0) * sp - x)

    # VPU-only accumulation into the resident (acc_rows, W) output block; the single
    # cross-lane/sublane reduce happens once, in the wrapper.
    out_ref[...] += loss.reshape(-1, acc_rows, W).sum(axis=0)[None]


def seg_loss(gt_seg, dt_seg, label_weight=(0.8, 1.0), *,
             binary_targets=False, bf16_transcendentals=False):
    """gt_seg: (N, H, W) targets (mask or float), dt_seg: (N, 1, h, w) logits."""
    pos_weight = float(label_weight[1]) / float(label_weight[0])

    N, H, W = gt_seg.shape
    _, C, h, w = dt_seg.shape
    assert C == 1

    dt_lo = dt_seg.reshape(N, h, w).astype(jnp.float32)   # squeeze channel (glue)

    # ---- gt: keep the dominant HBM stream narrow, without the uint8-255 wrap bug ----
    gdt = gt_seg.dtype
    if binary_targets:
        gt_in = (gt_seg != 0).astype(jnp.int8)             # caller asserts {0,1} semantics
        gt_bytes = 1
    elif gdt == jnp.bool_:
        gt_in = gt_seg.astype(jnp.int8)
        gt_bytes = 1
    elif gdt == jnp.int8 or gdt == jnp.uint8:              # exact 1-byte targets, shipped as-is
        gt_in = gt_seg
        gt_bytes = 1
    else:
        # Wide ints / floats go through f32 (exact for mask values |v| < 2^24).
        gt_in = gt_seg.astype(jnp.float32)
        gt_bytes = 4

    # ---- interpolation matrices ----
    A_h = bilinear_matrix(H, h)                            # (H, h)
    A_wT = bilinear_matrix(W, w).T                         # (w, W)

    # Height interpolation is a tiny matmul whose output keeps the narrow low-res width (w << W):
    # run it as one XLA einsum so the kernel needs no batched/broadcast matmuls or relayouts.
    xh = jnp.einsum('Hh,nhw->nHw', A_h, dt_lo)             # (N, H, w) f32

    # ---- generation-aware VMEM budgeting ----
    try:
        vmem_cap = int(pltpu.get_tpu_info().vmem_capacity_bytes)
    except Exception:
        vmem_cap = 64 * 1024 * 1024
    if vmem_cap >= 96 * 1024 * 1024:                       # v5e / v6e: 128 MiB physical VMEM
        step_budget = 40 * 1024 * 1024
        vmem_limit = 96 * 1024 * 1024
    else:                                                  # v7x: 64 MiB physical (32 MiB scoped)
        step_budget = 14 * 1024 * 1024
        vmem_limit = 32 * 1024 * 1024

    # Leading grid axis of size 2 feeds both TensorCores on v7x; harmless single-core elsewhere.
    nc = 2 if N >= 2 else 1
    per_core = -(-N // nc)

    # Per-slab-pixel bytes: gt (double-buffered) + ~5 live f32 temporaries + narrow logits slab.
    per_px = 2 * gt_bytes + 20 + 8.0 * w / W
    fixed = 2 * w * W * 4 + 8 * max(W, 128) * 4            # A_w^T (double-buffered) + accumulator
    avail = max(step_budget - fixed, 1 * 1024 * 1024)
    max_rows = max(8, int(avail / (per_px * W)))           # full-res rows per grid step

    row_unit = 32 if gt_bytes == 1 else 8                  # int8 packs 4 rows/sublane
    if max_rows >= H:
        tile_H = H
        B = int(min(per_core, max(1, max_rows // H)))
    else:
        # TODO(synk): if H has no divisor that is a multiple of row_unit under max_rows, this
        # falls back to tile_H = H and may exceed the per-step budget for extreme H*W.
        B = 1
        tile_H = _largest_divisor_leq(H, max_rows, multiple_of=row_unit)
    n_ht = H // tile_H
    n_steps = -(-per_core // B)

    # Pad the batch so every (core, step) is full. Pad logit -200 with target 0 contributes an
    # exactly-zero loss, so no masking is needed in the kernel (handles odd / ragged N).
    n_pad = nc * n_steps * B - N
    if n_pad > 0:
        xh = jnp.concatenate(
            [xh, jnp.full((n_pad, H, w), -200.0, jnp.float32)], axis=0)
        gt_in = jnp.concatenate(
            [gt_in, jnp.zeros((n_pad, H, W), gt_in.dtype)], axis=0)

    # Rows of the vreg-shaped resident accumulator (must divide B * tile_H).
    acc_rows = 8
    while acc_rows > 1 and (B * tile_H) % acc_rows != 0:
        acc_rows //= 2

    kernel = functools.partial(
        seg_loss_kernel,
        pos_weight=pos_weight,
        acc_rows=acc_rows,
        bf16_eup=bool(bf16_transcendentals),
    )

    out = pl.pallas_call(
        kernel,
        out_shape=jax.ShapeDtypeStruct((nc, acc_rows, W), jnp.float32),
        grid_spec=pltpu.PrefetchScalarGridSpec(
            num_scalar_prefetch=0,
            grid=(nc, n_steps, n_ht),
            in_specs=[
                pl.BlockSpec((B, tile_H, w), lambda c, n, t: (c * n_steps + n, t, 0)),  # logits
                pl.BlockSpec((B, tile_H, W), lambda c, n, t: (c * n_steps + n, t, 0)),  # targets
                pl.BlockSpec((w, W), lambda c, n, t: (0, 0)),                           # A_w^T
            ],
            out_specs=pl.BlockSpec((1, acc_rows, W), lambda c, n, t: (c, 0, 0)),        # per-core acc
        ),
        compiler_params=pltpu.CompilerParams(
            dimension_semantics=("parallel", "arbitrary", "arbitrary"),
            vmem_limit_bytes=vmem_limit,
        ),
    )(xh, gt_in, A_wT)

    # Single final reduce; the mean and the trailing /pos_weight fold into one scale.
    return jnp.sum(out) * jnp.float32(1.0 / (float(N) * H * W * pos_weight))


def seg_loss_ref(gt_seg, dt_seg, label_weight=(0.8, 1.0)):
    """Pure-JAX reference (faithful to the PyTorch formula) for sanity checking."""
    pos_weight = float(label_weight[1]) / float(label_weight[0])
    N, H, W = gt_seg.shape
    _, _, h, w = dt_seg.shape
    A_h = bilinear_matrix(H, h)
    A_w = bilinear_matrix(W, w)
    x = jnp.einsum("Hh,nhw,Ww->nHW", A_h, dt_seg.reshape(N, h, w).astype(jnp.float32), A_w)
    y = gt_seg.astype(jnp.float32)
    log_w = 1.0 + (pos_weight - 1.0) * y
    loss = (1.0 - y) * x + log_w * (jnp.log1p(jnp.exp(-jnp.abs(x))) + jnp.maximum(-x, 0.0))
    return jnp.mean(loss / pos_weight)


if __name__ == "__main__":
    key = jax.random.PRNGKey(0)
    k1, k2 = jax.random.split(key)

    N, H, W = 3, 64, 64          # odd N exercises the zero-loss padding + dual-core batch split
    h, w = 16, 16                # predicted (low-res) segmentation resolution

    gt_seg = (jax.random.uniform(k1, (N, H, W)) > 0.5).astype(jnp.int32)
    dt_seg = jax.random.normal(k2, (N, 1, h, w), dtype=jnp.float32)

    loss = seg_loss(gt_seg, dt_seg, binary_targets=True)
    loss = jax.block_until_ready(loss)

    ref = seg_loss_ref(gt_seg, dt_seg)
    assert jnp.allclose(loss, ref, atol=1e-4, rtol=1e-4), (loss, ref)

    print("KERNEL_OK")
</pallas_src>

<mosaic_0001>
module attributes {stable_mosaic.version = 11 : i64} {
  func.func @seg_loss_kernel(%arg0: i32, %arg1: i32, %arg2: i32, %arg3: memref<2x64x16xf32, #tpu.memory_space<vmem>>, %arg4: memref<2x64x64xi8, #tpu.memory_space<vmem>>, %arg5: memref<16x64xf32, #tpu.memory_space<vmem>>, %arg6: memref<1x8x64xf32, #tpu.memory_space<vmem>>) attributes {dimension_semantics = [#tpu.dimension_semantics<parallel>, #tpu.dimension_semantics<arbitrary>, #tpu.dimension_semantics<arbitrary>], iteration_bounds = array<i64: 2, 1, 1>, scalar_prefetch = 0 : i64, scratch_operands = 0 : i64, tpu.core_type = #tpu.core_type<tc>, window_params = [{transform_indices = @transform_0, window_bounds = array<i64: 2, 64, 16>}, {transform_indices = @transform_1, window_bounds = array<i64: 2, 64, 64>}, {pipeline_mode = #tpu.pipeline_mode<synchronous>, transform_indices = @transform_2, window_bounds = array<i64: 16, 64>}, {transform_indices = @transform_3, window_bounds = array<i64: 1, 8, 64>}]} {
    %c0_i32 = arith.constant 0 : i32
    %0 = arith.cmpi eq, %arg1, %c0_i32 : i32
    %c0_i32_0 = arith.constant 0 : i32
    %1 = arith.cmpi eq, %arg2, %c0_i32_0 : i32
    %2 = arith.andi %0, %1 : i1
    %3 = arith.extui %2 : i1 to i32
    %c0_i32_1 = arith.constant 0 : i32
    %4 = arith.cmpi ne, %3, %c0_i32_1 : i32
    scf.if %4 {
      %cst_20 = arith.constant 0.000000e+00 : f32
      %34 = vector.broadcast %cst_20 : f32 to vector<1x8x64xf32>
      %c0_21 = arith.constant 0 : index
      %c0_22 = arith.constant 0 : index
      %c0_23 = arith.constant 0 : index
      %35 = vector.load %arg6[%c0_21, %c0_22, %c0_23] : memref<1x8x64xf32, #tpu.memory_space<vmem>>, vector<1x8x64xf32>
      tpu.vector_store %arg6[%c0_21, %c0_22, %c0_23], %34 {strides = array<i32>} : memref<1x8x64xf32, #tpu.memory_space<vmem>>, vector<1x8x64xf32>,
    } else {
    }
    %c0 = arith.constant 0 : index
    %c0_2 = arith.constant 0 : index
    %c0_3 = arith.constant 0 : index
    %5 = vector.load %arg3[%c0, %c0_2, %c0_3] : memref<2x64x16xf32, #tpu.memory_space<vmem>>, vector<2x64x16xf32>
    %c0_4 = arith.constant 0 : index
    %c0_5 = arith.constant 0 : index
    %6 = vector.load %arg5[%c0_4, %c0_5] : memref<16x64xf32, #tpu.memory_space<vmem>>, vector<16x64xf32>
    %7 = vector.shape_cast %5 : vector<2x64x16xf32> to vector<128x16xf32>
    %cst = arith.constant dense<0.000000e+00> : vector<128x64xf32>
    %8 = tpu.matmul %7, %6, %cst {dimension_numbers = #tpu.dot_dimension_numbers<[1], [0], [0], [1], [0, 0, 1, 1], [], []>} : vector<128x16xf32>, vector<16x64xf32>, vector<128x64xf32> -> vector<128x64xf32>
    %c0_6 = arith.constant 0 : index
    %c0_7 = arith.constant 0 : index
    %c0_8 = arith.constant 0 : index
    %9 = vector.load %arg4[%c0_6, %c0_7, %c0_8] : memref<2x64x64xi8, #tpu.memory_space<vmem>>, vector<2x64x64xi8>
    %10 = arith.sitofp %9 : vector<2x64x64xi8> to vector<2x64x64xf32>
    %11 = vector.shape_cast %10 : vector<2x64x64xf32> to vector<128x64xf32>
    %12 = math.absf %8 : vector<128x64xf32>
    %cst_9 = arith.constant 0.000000e+00 : f32
    %13 = vector.broadcast %cst_9 : f32 to vector<128x64xf32>
    %14 = arith.subf %13, %12 : vector<128x64xf32>
    %15 = math.exp %14 : vector<128x64xf32>
    %16 = math.log1p %15 : vector<128x64xf32>
    %cst_10 = arith.constant 0.000000e+00 : f32
    %17 = vector.broadcast %cst_10 : f32 to vector<128x64xf32>
    %18 = arith.subf %17, %8 : vector<128x64xf32>
    %cst_11 = arith.constant 0.000000e+00 : f32
    %19 = vector.broadcast %cst_11 : f32 to vector<128x64xf32>
    %20 = arith.maximumf %18, %19 : vector<128x64xf32>
    %21 = arith.addf %20, %16 : vector<128x64xf32>
    %22 = arith.addf %8, %21 : vector<128x64xf32>
    %cst_12 = arith.constant 2.500000e-01 : f32
    %23 = vector.broadcast %cst_12 : f32 to vector<128x64xf32>
    %24 = arith.mulf %23, %21 : vector<128x64xf32>
    %25 = arith.subf %24, %8 : vector<128x64xf32>
    %26 = arith.mulf %11, %25 : vector<128x64xf32>
    %27 = arith.addf %22, %26 : vector<128x64xf32>
    %c0_13 = arith.constant 0 : index
    %c0_14 = arith.constant 0 : index
    %c0_15 = arith.constant 0 : index
    %28 = vector.load %arg6[%c0_13, %c0_14, %c0_15] : memref<1x8x64xf32, #tpu.memory_space<vmem>>, vector<1x8x64xf32>
    %29 = vector.shape_cast %27 : vector<128x64xf32> to vector<16x8x64xf32>
    %cst_16 = arith.constant dense<0.000000e+00> : vector<8x64xf32>
    %30 = vector.multi_reduction <add>, %29, %cst_16 [0] : vector<16x8x64xf32> to vector<8x64xf32>
    %31 = vector.shape_cast %30 : vector<8x64xf32> to vector<1x8x64xf32>
    %32 = arith.addf %28, %31 : vector<1x8x64xf32>
    %c0_17 = arith.constant 0 : index
    %c0_18 = arith.constant 0 : index
    %c0_19 = arith.constant 0 : index
    %33 = vector.load %arg6[%c0_17, %c0_18, %c0_19] : memref<1x8x64xf32, #tpu.memory_space<vmem>>, vector<1x8x64xf32>
    tpu.vector_store %arg6[%c0_17, %c0_18, %c0_19], %32 {strides = array<i32>} : memref<1x8x64xf32, #tpu.memory_space<vmem>>, vector<1x8x64xf32>,
    return
  }
  func.func @transform_0(%arg0: i32, %arg1: i32, %arg2: i32) -> (i32, i32, i32) {
    %c1_i32 = arith.constant 1 : i32
    %0 = arith.muli %arg0, %c1_i32 : i32
    %1 = arith.addi %0, %arg1 : i32
    %c0_i32 = arith.constant 0 : i32
    %c0_i32_0 = arith.constant 0 : i32
    return %1, %arg2, %c0_i32 : i32, i32, i32
  }
  func.func @transform_1(%arg0: i32, %arg1: i32, %arg2: i32) -> (i32, i32, i32) {
    %c1_i32 = arith.constant 1 : i32
    %0 = arith.muli %arg0, %c1_i32 : i32
    %1 = arith.addi %0, %arg1 : i32
    %c0_i32 = arith.constant 0 : i32
    %c0_i32_0 = arith.constant 0 : i32
    return %1, %arg2, %c0_i32 : i32, i32, i32
  }
  func.func @transform_2(%arg0: i32, %arg1: i32, %arg2: i32) -> (i32, i32) {
    %c0_i32 = arith.constant 0 : i32
    %c0_i32_0 = arith.constant 0 : i32
    %c0_i32_1 = arith.constant 0 : i32
    return %c0_i32, %c0_i32_0 : i32, i32
  }
  func.func @transform_3(%arg0: i32, %arg1: i32, %arg2: i32) -> (i32, i32, i32) {
    %c0_i32 = arith.constant 0 : i32
    %c0_i32_0 = arith.constant 0 : i32
    %c0_i32_1 = arith.constant 0 : i32
    return %arg0, %c0_i32, %c0_i32_0 : i32, i32, i32
  }
}

</mosaic_0001>

<bundles_post_ra>
// kernel: tpu_custom_call.1
= control target key start
LH: loop header
LB: loop body
LE: loop exit
PB: predicated region body
PF: predicated region fallthrough
CT: control target
= control target key end

     0   :  { %8 = vsyncpa [#allocation3], 0  ;;  %s1790_s0 = inlined_call_operand.vmem [shape: f32[4,64,16], index: 0, kind: input, shape index: {}]   ;;  %s1791_s1 = inlined_call_operand.vmem [shape: s8[4,64,64], index: 1, kind: input, shape index: {}]   ;;  %s1792_s2 = inlined_call_operand.vmem [shape: f32[16,64], index: 2, kind: input, shape index: {}]   ;;  %s1793_s3 = inlined_call_operand.hbm [shape: f32[2,8,64], index: 3, kind: output, shape index: {}]  }
   0x1   :  { %10 = vsyncpa [#allocation3 + $0x1], 0  ;;  %s1307_s12 = smov 0   ;;  %s1309_s13 = smov 0  }
   0x2   :  { %s1311_s14 = smov 0   ;;  %s1313_s15 = smov 0  }
   0x3   :  { %s1315_s16 = smov 0   ;;  %s1317_s17 = smov 0  }
   0x4 LB: > { %s999_s18 = sadd.s32 4294967295, %s1283_s17   ;;  %s1000_s19 = sadd.s32 4294967294, %s1283_s17   ;;  %s1283_s17 = sphi %s1317_s17, %s16_s17   ;;  %s1279_s16 = sphi %s1315_s16, %s1849_s16   ;;  %s1275_s15 = sphi %s1313_s15, %s1848_s15   ;;  %s1271_s14 = sphi %s1311_s14, %s1847_s14   ;;  %s1267_s13 = sphi %s1309_s13, %s1846_s13   ;;  %s1263_s12 = sphi %s1307_s12, %s1845_s12  }
   0x5   : > { %s35_s20 = sadd.s32 1, %s1279_s16  ;;  %s123_s21 = sadd.s32 1, %s1271_s14 }
   0x6   : > { %p37_p0 = scmp.ge.s32.totalorder %s35_s20, 2  ;;  %p133_p1 = scmp.ne.s32.totalorder %s1271_s14, %s1267_s13 }
   0x7   : > { %p134_p2 = scmp.eq.s32.totalorder %s999_s18, 1  ;;  %p139_p3 = scmp.ne.s32.totalorder %s1267_s13, %s1263_s12 }
   0x8   : > { %s1851_s20 = smov (%p37_p0, %s35_s20), 0  ;;  %p140_p5 = scmp.eq.s32.totalorder %s1000_s19, 1 }
   0x9   : > { %p1347_p4 = por %p134_p2, %p133_p1  ;;  %s120_s23 = ssub.s32 %s1279_s16, %s1851_s20 }
   0xa   : > { %p1003_p6 = scmp.ge.s32.totalorder %s1283_s17, 1  ;;  %p121_p7 = scmp.eq.s32.totalorder %s120_s23, 0 }
   0xb   : > { %p1354_p8 = por %p140_p5, %p139_p3  ;;  %p195_p9 = scmp.lt.s32.totalorder %s1283_s17, 3 }
   0xc   : > { %s1360_s25 = scalar_select %p121_p7, %s1271_s14, %s123_s21  }
   0xd   : > { %p196_p10 = pnand %p1003_p6, %p195_p9 }
   0xf   : > { %199 = sbr.rel (%p196_p10) target bundleno = 381 (0x17d), region = 32 }
  0x16   : > { %v288_v0 = vld [vmem:[%s1792_s2] sm:$0xff]  ;;  %v289_v1 = vld [vmem:[%s1792_s2 + $0x8] sm:$0xff]  ;;  %s1005_s30 = sshll.u32 %s1275_s15, 1  ;;  %vm290_vm0 = vcmask 130048   ;;  %s233_s8 = sand.u32 1, %s1267_s13   ;;  %vm270_vm1 = vcmask 523264  }
  0x17   : > { %v1079_v2 = vpack.c.bf16 %v289_v1, %v288_v0  ;;  %p239_p11 = scmp.lt.s32.totalorder %s1005_s30, 3  ;;  %s1004_s9 = sshll.u32 %s233_s8, 3  ;;  %v1285_v19 = vmov 0.0  }
  0x18   : > { %s1395_s11 = scalar_lea.vmem [#allocation2], %s1004_s9  ;;  %s1028_s23 = sshll.u32 %s1275_s15, 7 }
  0x19   : > { %1080 = vmatprep.subr.bf16.mxu0 %v1079_v2  ;;  %1083 = vmatprep.subr.bf16.mxu1 %v1079_v2  ;;  %s1853_s30 = smov (!%p239_p11, %s1005_s30), 3  ;;  %271 = vst.msk [vmem:[%s1395_s11] sm:$0xff] %vm270_vm1, %v1285_v19  ;;  %s905_s26 = sshll.u32 %s1395_s11, 4  ;;  %s1741_s26 = int_to_ptr.vmem [resolvable:$true] %s905_s26 }
  0x1a   : > { %1082 = vmatpush3.bf16.msra.mxu0 %v1079_v2  ;;  %1084 = vmatpush3.bf16.msra.mxu1 %v1079_v2  ;;  %s1031_s4 = sshll.u32 %s1853_s30, 6  ;;  %s1032_s10 = sshll.u32 %s1853_s30, 4 }
  0x1b   : > { %s246_s7 = scalar_lea.vmem %s1790_s0, %s1031_s4  ;;  %s1402_s21 = scalar_lea.vmem %s1791_s1, %s1032_s10 }
  0x1c   : > { %v272_v3 = vld [vmem:[%s246_s7] sm:$0xff]  ;;  %v273_v5 = vld [vmem:[%s246_s7 + $0x8] sm:$0xff]  ;;  %v274_v7 = vld [vmem:[%s246_s7 + $0x10] sm:$0xff]  ;;  %s1739_s29 = scalar_lea.hbm %s1793_s3, %s1028_s23  ;;  %s892_s30 = scalar_lea.sflag [#allocation3], %s233_s8 }
  0x1d   : > { %v280_v4 = vld [vmem:[%s246_s7 + $0x40] sm:$0xff]  ;;  %1055 = vmatprep.mubr.msk.f32.mxu0 %vm290_vm0, %v272_v3  ;;  %v281_v6 = vld [vmem:[%s246_s7 + $0x48] sm:$0xff]  ;;  %v282_v8 = vld [vmem:[%s246_s7 + $0x50] sm:$0xff]  ;;  %s1205_s4 = scalar_lea.vmem %s1741_s26, 128  ;;  %s1286_s15 = smov [#allocation2]  }
  0x1e   : > { %1067 = vmatprep.mubr.msk.f32.mxu1 %vm290_vm0, %v280_v4  ;;  %1056 = vmatmul.mubr.msk.f32.vlgmr.msra.gmra.mrb[0].mxu0 %vm290_vm0, %v273_v5  ;;  %v275_v9 = vld [vmem:[%s246_s7 + $0x18] sm:$0xff]  ;;  %v276_v11 = vld [vmem:[%s246_s7 + $0x20] sm:$0xff]  ;;  %v277_v13 = vld [vmem:[%s246_s7 + $0x28] sm:$0xff]  ;;  %p1206_p12 = scmp.ne.s32.totalorder %s1741_s26, %s1205_s4  ;;  %s1209_s5 = sshll.u32 %s1286_s15, 4  ;;  %s1210_s5 = int_to_ptr.vmem [resolvable:$false] %s1209_s5 }
  0x1f   : > { %1068 = vmatmul.mubr.msk.f32.vlgmr.msra.gmra.mrb[0].mxu1 %vm290_vm0, %v281_v6  ;;  %1058 = vmatprep.mubr.msk.f32.mxu0 %vm290_vm0, %v274_v7  ;;  %v283_v10 = vld [vmem:[%s246_s7 + $0x58] sm:$0xff]  ;;  %v284_v12 = vld [vmem:[%s246_s7 + $0x60] sm:$0xff]  ;;  %v285_v14 = vld [vmem:[%s246_s7 + $0x68] sm:$0xff]  ;;  %s1211_s6 = scalar_lea.vmem %s1210_s5, 256  ;;  %p1212_p1 = scmp.lt.s32.totalorder %s1741_s26, %s1210_s5 }
  0x20   : > { %1070 = vmatprep.mubr.msk.f32.mxu1 %vm290_vm0, %v282_v8  ;;  %v278_v15 = vld [vmem:[%s246_s7 + $0x30] sm:$0xff]  ;;  %v279_v17 = vld [vmem:[%s246_s7 + $0x38] sm:$0xff]  ;;  %v484_v20 = vld [vmem:[%s1402_s21] sm:$0xff]  ;;  %p1207_p13 = pnand %p1206_p12, %p1347_p4  ;;  %p1213_p2 = scmp.lt.s32.totalorder %s1211_s6, %s1205_s4 }
  0x21   : > { %v286_v16 = vld [vmem:[%s246_s7 + $0x70] sm:$0xff]  ;;  %v287_v18 = vld [vmem:[%s246_s7 + $0x78] sm:$0xff]  ;;  %v489_v23 = vunpack.c.1.s8 %v484_v20  ;;  %v488_v28 = vunpack.c.0.s8 %v484_v20  ;;  %v491_v32 = vunpack.c.3.s8 %v484_v20  ;;  %v490_v36 = vunpack.c.2.s8 %v484_v20 }
  0x22   : > { %1059 = vmatmul.mubr.msk.f32.gmra.mrb[2].mxu0 %vm290_vm0, %v275_v9  ;;  %v1406_v21 = vld [vmem:[%s1402_s21 + $0x10] sm:$0xff]  ;;  %v1462_v9 = vld [vmem:[%s1402_s21 + $0x8] sm:$0xff]  ;;  %p1208_p0 = pneg %p1207_p13  ;;  %p1214_p3 = por %p1213_p2, %p1212_p1 }
  0x23   : > { %1071 = vmatmul.mubr.msk.f32.gmra.mrb[2].mxu1 %vm290_vm0, %v283_v10  ;;  %1061 = vmatprep.mubr.msk.f32.mxu0 %vm290_vm0, %v276_v11  ;;  %v497_v25 = vunpack.c.1.s8 %v1406_v21  ;;  %v496_v29 = vunpack.c.0.s8 %v1406_v21  ;;  %v499_v33 = vunpack.c.3.s8 %v1406_v21  ;;  %v1421_v37 = vcvt.s32.f32 %v489_v23 }
  0x24   : > { %1073 = vmatprep.mubr.msk.f32.mxu1 %vm290_vm0, %v284_v12  ;;  %v1427_v43 = vcvt.s32.f32 %v488_v28  ;;  %v1435_v49 = vcvt.s32.f32 %v491_v32  ;;  %v1445_v55 = vcvt.s32.f32 %v490_v36  ;;  %p1215_p5 = pnand %p1214_p3, %p1208_p0 }
  0x25   : > { %v1423_v38 = vcvt.s32.f32 %v497_v25  ;;  %v1429_v44 = vcvt.s32.f32 %v496_v29  ;;  %v1437_v50 = vcvt.s32.f32 %v499_v33 }
  0x26   : > { %1062 = vmatmul.mubr.msk.f32.gmra.mrb[4].mxu0 %vm290_vm0, %v277_v13 }
  0x27   : > { %1074 = vmatmul.mubr.msk.f32.gmra.mrb[4].mxu1 %vm290_vm0, %v285_v14  ;;  %1064 = vmatprep.mubr.msk.f32.mxu0 %vm290_vm0, %v278_v15 }
  0x28   : > { %1076 = vmatprep.mubr.msk.f32.mxu1 %vm290_vm0, %v286_v16 }
  0x2a   : > { %1065 = vmatmul.mubr.msk.f32.gmra.mrb[6].mxu0 %vm290_vm0, %v279_v17 }
  0x2b   : > { %1077 = vmatmul.mubr.msk.f32.gmra.mrb[6].mxu1 %vm290_vm0, %v287_v18 }
  0xf1   : > { %v1408_v22 = vpop.f32.mrb[0].mxu0 }
  0xf2   : > { %v1410_v24 = vpop.f32.mrb[0].mxu1  ;;  %v521_v26 = vand.u32 2147483647, %v1408_v22  ;;  %v1416_v30 = vpop.f32.mrb[1].mxu0  ;;  %v729_v60 = vsub.f32 0.0, %v1408_v22 }
  0xf3   : > { %v529_v27 = vand.u32 2147483647, %v1410_v24  ;;  %v1418_v31 = vpop.f32.mrb[1].mxu1  ;;  %v520_v39 = vand.u32 2147483647, %v1416_v30  ;;  %v737_v1 = vsub.f32 0.0, %v1410_v24 }
  0xf4   : > { %v537_v34 = vsub.f32 0.0, %v521_v26  ;;  %v528_v40 = vand.u32 2147483647, %v1418_v31  ;;  %v728_v2 = vsub.f32 0.0, %v1416_v30  ;;  %v736_v10 = vsub.f32 0.0, %v1418_v31 }
  0xf5   : > { %v545_v35 = vsub.f32 0.0, %v529_v27  ;;  %v1431_v45 = vpop.f32.mrb[2].mxu0  ;;  %v536_v47 = vsub.f32 0.0, %v520_v39  ;;  %v1478_v27 = vmax.f32 %v729_v60, 0.0  ;;  %v1481_v32 = vmax.f32 %v737_v1, 0.0 }
  0xf6   : > { %v554_v41 = vmul.f32 1.442695, %v537_v34  ;;  %v1433_v46 = vpop.f32.mrb[2].mxu1  ;;  %v544_v48 = vsub.f32 0.0, %v528_v40  ;;  %v1439_v51 = vpop.f32.mrb[3].mxu0  ;;  %v731_v11 = vsub.f32 0.0, %v1431_v45 }
  0xf7   : > { %v570_v42 = vmul.f32 1.442695, %v545_v35  ;;  %v1441_v52 = vpop.f32.mrb[3].mxu1  ;;  %v523_v53 = vand.u32 2147483647, %v1431_v45  ;;  %v739_v15 = vsub.f32 0.0, %v1433_v46 }
  0xf8   : > { %1141 = vpow2.f32 %v554_v41  ;;  %v531_v54 = vand.u32 2147483647, %v1433_v46  ;;  %v552_v56 = vmul.f32 1.442695, %v536_v47  ;;  %v568_v57 = vmul.f32 1.442695, %v544_v48 }
  0xf9   : > { %1143 = vpow2.f32 %v570_v42  ;;  %v1448_v59 = vpop.f32.mrb[4].mxu0  ;;  %v539_v61 = vsub.f32 0.0, %v523_v53  ;;  %v522_v63 = vand.u32 2147483647, %v1439_v51  ;;  %v530_v3 = vand.u32 2147483647, %v1441_v52 }
  0xfa   : > { %1804 = vst [vmem:[#allocation5_spill] sm:$0xff] %v1448_v59  ;;  %v547_v62 = vsub.f32 0.0, %v531_v54  ;;  %v1452_v0 = vpop.f32.mrb[4].mxu1  ;;  %1145 = vpow2.f32 %v552_v56  ;;  %v1457_v4 = vpop.f32.mrb[5].mxu0  ;;  %v525_v13 = vand.u32 2147483647, %v1448_v59 }
  0xfb   : > { %1805 = vst [vmem:[#allocation6_spill] sm:$0xff] %v1457_v4  ;;  %v1459_v5 = vpop.f32.mrb[5].mxu1  ;;  %1147 = vpow2.f32 %v568_v57  ;;  %v558_v6 = vmul.f32 1.442695, %v539_v61  ;;  %v538_v8 = vsub.f32 0.0, %v522_v63  ;;  %v546_v12 = vsub.f32 0.0, %v530_v3 }
  0xfc   : > { %v574_v7 = vmul.f32 1.442695, %v547_v62  ;;  %v533_v17 = vand.u32 2147483647, %v1452_v0  ;;  %v730_v19 = vsub.f32 0.0, %v1439_v51  ;;  %v541_v23 = vsub.f32 0.0, %v525_v13 }
  0xfd   : > { %v1467_v14 = vpop.f32.mrb[6].mxu0  ;;  %1149 = vpow2.f32 %v558_v6  ;;  %v556_v16 = vmul.f32 1.442695, %v538_v8  ;;  %v572_v20 = vmul.f32 1.442695, %v546_v12  ;;  %v1483_v33 = vmax.f32 %v728_v2, 0.0 }
  0xfe   : > { %1806 = vst [vmem:[#allocation7_spill] sm:$0xff] %v1467_v14  ;;  %v1471_v18 = vpop.f32.mrb[6].mxu1  ;;  %1151 = vpow2.f32 %v574_v7  ;;  %v1474_v25 = vpop.f32.mrb[7].mxu0  ;;  %v549_v29 = vsub.f32 0.0, %v533_v17  ;;  %v562_v34 = vmul.f32 1.442695, %v541_v23 }
  0xff   : > { %1807 = vst [vmem:[#allocation8_spill] sm:$0xff] %v1471_v18  ;;  %1808 = vst [vmem:[#allocation9_spill] sm:$0xff] %v1474_v25  ;;  %v1476_v26 = vpop.f32.mrb[7].mxu1  ;;  %1153 = vpow2.f32 %v556_v16  ;;  %v1485_v36 = vmax.f32 %v736_v10, 0.0  ;;  %v1487_v39 = vmax.f32 %v731_v11, 0.0  ;;  %v738_v40 = vsub.f32 0.0, %v1441_v52 }
 0x100   : > { %1809 = vst [vmem:[#allocation10_spill] sm:$0xff] %v1476_v26  ;;  %1155 = vpow2.f32 %v572_v20  ;;  %v733_v41 = vsub.f32 0.0, %v1448_v59  ;;  %v1491_v48 = vmax.f32 %v739_v15, 0.0  ;;  %v1493_v53 = vmax.f32 %v730_v19, 0.0 }
 0x101   : > { %v578_v54 = vmul.f32 1.442695, %v549_v29  ;;  %1157 = vpow2.f32 %v562_v34  ;;  %v524_v60 = vand.u32 2147483647, %v1457_v4  ;;  %v1496_v6 = vmax.f32 %v738_v40, 0.0 }
 0x102   : > { %v1142_v35 = vpop.eup %1141  ;;  %v1498_v7 = vmax.f32 %v733_v41, 0.0 }
 0x103   : > { %v1144_v42 = vpop.eup %1143  ;;  %v593_v47 = vadd.f32 1.0, %v1142_v35  ;;  %v596_v56 = vmul.f32 -0.5, %v1142_v35  ;;  %v599_v62 = vand.u32 2147483647, %v1142_v35  ;;  %v1501_v16 = vsub.f32 0.0, %v524_v60 }
 0x104   : > { %v665_v57 = vadd.f32 1.0, %v1144_v42  ;;  %v1146_v61 = vpop.eup %1145  ;;  %v668_v63 = vmul.f32 -0.5, %v1144_v42  ;;  %v671_v1 = vand.u32 2147483647, %v1144_v42 }
 0x105   : > { %1159 = vlog2.f32 %v593_v47  ;;  %v1148_v2 = vpop.eup %1147  ;;  %v584_v3 = vadd.f32 1.0, %v1146_v61  ;;  %v587_v8 = vmul.f32 -0.5, %v1146_v61  ;;  %v597_v13 = vadd.f32 1.0, %v596_v56 }
 0x106   : > { %1161 = vlog2.f32 %v665_v57  ;;  %v656_v10 = vadd.f32 1.0, %v1148_v2  ;;  %v659_v15 = vmul.f32 -0.5, %v1148_v2  ;;  %vm1503_vm2 = vcmp.lt.f32.partialorder %v599_v62, 0.0004427343 }
 0x107   : > { %1163 = vpow2.f32 %v578_v54  ;;  %v1150_v12 = vpop.eup %1149  ;;  %v669_v20 = vadd.f32 1.0, %v668_v63  ;;  %vm1507_vm3 = vcmp.lt.f32.partialorder %v671_v1, 0.0004427343  ;;  %v588_v40 = vadd.f32 1.0, %v587_v8 }
 0x108   : > { %1165 = vlog2.f32 %v584_v3  ;;  %v1152_v17 = vpop.eup %1151  ;;  %v611_v29 = vadd.f32 1.0, %v1150_v12  ;;  %v590_v41 = vand.u32 2147483647, %v1146_v61  ;;  %v662_v47 = vand.u32 2147483647, %v1148_v2 }
 0x109   : > { %1167 = vlog2.f32 %v656_v10  ;;  %v1154_v34 = vpop.eup %1153  ;;  %v614_v54 = vmul.f32 -0.5, %v1150_v12  ;;  %v660_v57 = vadd.f32 1.0, %v659_v15  ;;  %v683_v60 = vadd.f32 1.0, %v1152_v17 }
 0x10a   : > { %v1511_v56 = vpop.eup %1155  ;;  %1169 = vlog2.f32 %v611_v29  ;;  %v686_v62 = vmul.f32 -0.5, %v1152_v17  ;;  %v598_v3 = vmul.f32 %v1142_v35, %v597_v13  ;;  %v617_v63 = vand.u32 2147483647, %v1150_v12 }
 0x10b   : > { %v615_v11 = vadd.f32 1.0, %v614_v54  ;;  %v689_v1 = vand.u32 2147483647, %v1152_v17  ;;  %1171 = vlog2.f32 %v683_v60  ;;  %v602_v58 = vadd.f32 1.0, %v1154_v34  ;;  %v1513_v4 = vpop.eup %1157 }
 0x10c   : > { %v687_v28 = vadd.f32 1.0, %v686_v62  ;;  %v605_v10 = vmul.f32 -0.5, %v1154_v34  ;;  %v670_v8 = vmul.f32 %v1144_v42, %v669_v20  ;;  %vm1515_vm4 = vcmp.lt.f32.partialorder %v590_v41, 0.0004427343 }
 0x10d   : > { %vm1519_vm5 = vcmp.lt.f32.partialorder %v662_v47, 0.0004427343  ;;  %v674_v35 = vadd.f32 1.0, %v1511_v56  ;;  %v589_v29 = vmul.f32 %v1146_v61, %v588_v40  ;;  %v661_v54 = vmul.f32 %v1148_v2, %v660_v57 }
 0x10e   : > { %1173 = vlog2.f32 %v602_v58  ;;  %v677_v60 = vmul.f32 -0.5, %v1511_v56  ;;  %v616_v18 = vmul.f32 %v1150_v12, %v615_v11  ;;  %vm1525_vm6 = vcmp.lt.f32.partialorder %v617_v63, 0.0004427343 }
 0x10f   : > { %v1160_v13 = vpop.eup %1159  ;;  %vm1529_vm7 = vcmp.lt.f32.partialorder %v689_v1, 0.0004427343  ;;  %v606_v41 = vadd.f32 1.0, %v605_v10  ;;  %v688_v61 = vmul.f32 %v1152_v17, %v687_v28  ;;  %v608_v2 = vand.u32 2147483647, %v1154_v34 }
 0x110   : > { %v1162_v62 = vpop.eup %1161  ;;  %v595_v25 = vmul.f32 0.6931472, %v1160_v13  ;;  %v629_v58 = vadd.f32 1.0, %v1513_v4  ;;  %1175 = vlog2.f32 %v674_v35  ;;  %v678_v12 = vadd.f32 1.0, %v677_v60 }
 0x111   : > { %v1533_v47 = vpop.eup %1163  ;;  %v667_v14 = vmul.f32 0.6931472, %v1162_v62  ;;  %v632_v57 = vmul.f32 -0.5, %v1513_v4  ;;  %v680_v28 = vand.u32 2147483647, %v1511_v56  ;;  %v607_v59 = vmul.f32 %v1154_v34, %v606_v41 }
 0x112   : > { %v1166_v40 = vpop.eup %1165  ;;  %v601_v11 = vsel %vm1503_vm2, %v598_v3, %v595_v25  ;;  %1177 = vlog2.f32 %v629_v58  ;;  %vm1546_vm8 = vcmp.lt.f32.partialorder %v608_v2, 0.0004427343  ;;  %v679_v34 = vmul.f32 %v1511_v56, %v678_v12 }
 0x113   : > { %v1168_v63 = vpop.eup %1167  ;;  %v761_v1 = vadd.f32 %v1478_v27, %v601_v11  ;;  %v673_v10 = vsel %vm1507_vm3, %v670_v8, %v667_v14  ;;  %v586_v13 = vmul.f32 0.6931472, %v1166_v40  ;;  %v633_v27 = vadd.f32 1.0, %v632_v57 }
 0x114   : > { %v769_v17 = vadd.f32 %v1481_v32, %v673_v10  ;;  %v658_v62 = vmul.f32 0.6931472, %v1168_v63  ;;  %v1170_v19 = vpop.eup %1169  ;;  %v635_v14 = vand.u32 2147483647, %v1513_v4  ;;  %vm1558_vm9 = vcmp.lt.f32.partialorder %v680_v28, 0.0004427343 }
 0x115   : > { %v793_v25 = vmul.f32 0.25, %v761_v1  ;;  %v592_v3 = vsel %vm1515_vm4, %v589_v29, %v586_v13  ;;  %v1172_v60 = vpop.eup %1171  ;;  %v777_v41 = vadd.f32 %v1408_v22, %v761_v1  ;;  %v613_v2 = vmul.f32 0.6931472, %v1170_v19 }
 0x116   : > { %v801_v23 = vmul.f32 0.25, %v769_v17  ;;  %v760_v8 = vadd.f32 %v1483_v33, %v592_v3  ;;  %v664_v32 = vsel %vm1519_vm5, %v661_v54, %v658_v62  ;;  %v785_v40 = vadd.f32 %v1410_v24, %v769_v17 }
 0x117   : > { %v809_v26 = vsub.f32 %v793_v25, %v1408_v22  ;;  %v768_v29 = vadd.f32 %v1485_v36, %v664_v32  ;;  %v685_v54 = vmul.f32 0.6931472, %v1172_v60  ;;  %v619_v22 = vsel %vm1525_vm6, %v616_v18, %v613_v2 }
 0x118   : > { %v817_v33 = vsub.f32 %v801_v23, %v1410_v24  ;;  %v792_v15 = vmul.f32 0.25, %v760_v8  ;;  %v1174_v11 = vpop.eup %1173  ;;  %v634_v36 = vmul.f32 %v1513_v4, %v633_v27  ;;  %v763_v1 = vadd.f32 %v1487_v39, %v619_v22 }
 0x119   : > { %v825_v56 = vmul.f32 %v809_v26, %v1421_v37  ;;  %v800_v12 = vmul.f32 0.25, %v768_v29  ;;  %v691_v24 = vsel %vm1529_vm7, %v688_v61, %v685_v54  ;;  %v604_v28 = vmul.f32 0.6931472, %v1174_v11 }
 0x11a   : > { %v833_v57 = vmul.f32 %v817_v33, %v1423_v38  ;;  %v808_v63 = vsub.f32 %v792_v15, %v1416_v30  ;;  %v771_v37 = vadd.f32 %v1491_v48, %v691_v24  ;;  %v1176_v17 = vpop.eup %1175  ;;  %v776_v4 = vadd.f32 %v760_v8, %v1416_v30 }
 0x11b   : > { %v841_v10 = vadd.f32 %v825_v56, %v777_v41  ;;  %v816_v13 = vsub.f32 %v800_v12, %v1418_v31  ;;  %v795_v18 = vmul.f32 0.25, %v763_v1  ;;  %v784_v62 = vadd.f32 %v768_v29, %v1418_v31 }
 0x11c   : > { %v1575_v42 = vadd.f32 %v833_v57, %v785_v40  ;;  %v824_v38 = vmul.f32 %v808_v63, %v1427_v43  ;;  %v779_v20 = vadd.f32 %v1431_v45, %v763_v1  ;;  %v803_v61 = vmul.f32 0.25, %v771_v37  ;;  %v1178_v19 = vpop.eup %1177  ;;  %v1829_v1 = vld [vmem:[#allocation5_spill] sm:$0xff] }
 0x11d   : > { %v832_v39 = vmul.f32 %v816_v13, %v1429_v44  ;;  %v859_v25 = vsel %vm270_vm1, %v841_v10, 0.0  ;;  %v811_v3 = vsub.f32 %v795_v18, %v1431_v45  ;;  %v610_v27 = vsel %vm1546_vm8, %v607_v59, %v604_v28  ;;  %v1830_v13 = vld [vmem:[#allocation7_spill] sm:$0xff] }
 0x11e   : > { %v840_v48 = vadd.f32 %v824_v38, %v776_v4  ;;  %v819_v43 = vsub.f32 %v803_v61, %v1433_v46  ;;  %v762_v31 = vadd.f32 %v1493_v53, %v610_v27  ;;  %v676_v23 = vmul.f32 0.6931472, %v1176_v17  ;;  %v1831_v4 = vld [vmem:[#allocation8_spill] sm:$0xff] }
 0x11f   : > { %v1586_v30 = vadd.f32 %v832_v39, %v784_v62  ;;  %v827_v8 = vmul.f32 %v811_v3, %v1435_v49  ;;  %v631_v32 = vmul.f32 0.6931472, %v1178_v19  ;;  %v701_v60 = vadd.f32 1.0, %v1533_v47  ;;  %v1624_v39 = vld [vmem:[%s1402_s21 + $0x18] sm:$0xff] }
 0x120   : > { %v858_v44 = vsel %vm270_vm1, %v840_v48, 0.0  ;;  %v787_v45 = vadd.f32 %v1433_v46, %v771_v37  ;;  %v835_v35 = vmul.f32 %v819_v43, %v1437_v50  ;;  %vm636_vm10 = vcmp.lt.f32.partialorder %v635_v14, 0.0004427343  ;;  %v1832_v43 = vld [vmem:[#allocation9_spill] sm:$0xff] }
 0x121   : > { %v860_v41 = vadd.f32 %v859_v25, %v858_v44  ;;  %v843_v59 = vadd.f32 %v827_v8, %v779_v20  ;;  %v794_v26 = vmul.f32 0.25, %v762_v31  ;;  %v682_v29 = vsel %vm1558_vm9, %v679_v34, %v676_v23 }
 0x122   : > { %v637_v53 = vsel %vm636_vm10, %v634_v36, %v631_v32  ;;  %v1597_v2 = vadd.f32 %v835_v35, %v787_v45  ;;  %v770_v40 = vadd.f32 %v1496_v6, %v682_v29  ;;  %1179 = vlog2.f32 %v701_v60 }
 0x123   : > { %v765_v49 = vadd.f32 %v1498_v7, %v637_v53  ;;  %v810_v33 = vsub.f32 %v794_v26, %v1439_v51  ;;  %v704_v46 = vmul.f32 -0.5, %v1533_v47  ;;  %v1826_v50 = vunpack.c.2.s8 %v1406_v21 }
 0x124   : > { %v802_v15 = vmul.f32 0.25, %v770_v40  ;;  %v1827_v54 = vunpack.c.1.s8 %v1462_v9  ;;  %v778_v34 = vadd.f32 %v762_v31, %v1439_v51  ;;  %v741_v6 = vsub.f32 0.0, %v1452_v0 }
 0x125   : > { %v514_v14 = vcvt.s32.f32 %v1826_v50  ;;  %v826_v11 = vmul.f32 %v810_v33, %v1445_v55  ;;  %v797_v56 = vmul.f32 0.25, %v765_v49  ;;  %v707_v12 = vand.u32 2147483647, %v1533_v47 }
 0x126   : > { %v509_v58 = vcvt.s32.f32 %v1827_v54  ;;  %v818_v7 = vsub.f32 %v802_v15, %v1441_v52  ;;  %v560_v22 = vmul.f32 1.442695, %v1501_v16  ;;  %v1828_v21 = vand.u32 2147483647, %v1459_v5 }
 0x127   : > { %v842_v57 = vadd.f32 %v826_v11, %v778_v34  ;;  %v786_v63 = vadd.f32 %v770_v40, %v1441_v52  ;;  %v813_v51 = vsub.f32 %v797_v56, %v1829_v1  ;;  %v705_v24 = vadd.f32 1.0, %v704_v46 }
 0x128   : > { %v548_v36 = vsub.f32 0.0, %v1828_v21  ;;  %v834_v55 = vmul.f32 %v818_v7, %v514_v14  ;;  %1181 = vpow2.f32 %v560_v22  ;;  %v527_v37 = vand.u32 2147483647, %v1830_v13 }
 0x129   : > { %v861_v28 = vsel %vm270_vm1, %v842_v57, 0.0  ;;  %v781_v17 = vadd.f32 %v1829_v1, %v765_v49  ;;  %v829_v16 = vmul.f32 %v813_v51, %v509_v58  ;;  %v535_v38 = vand.u32 2147483647, %v1831_v4 }
 0x12a   : > { %v576_v10 = vmul.f32 1.442695, %v548_v36  ;;  %v862_v18 = vadd.f32 %v861_v28, %v860_v41  ;;  %v1621_v62 = vadd.f32 %v834_v55, %v786_v63  ;;  %v543_v52 = vsub.f32 0.0, %v527_v37  ;;  %v1833_v41 = vld [vmem:[#allocation10_spill] sm:$0xff] }
 0x12b   : > { %v863_v20 = vsel %vm270_vm1, %v843_v59, 0.0  ;;  %v1627_v61 = vadd.f32 %v829_v16, %v781_v17  ;;  %v706_v19 = vmul.f32 %v1533_v47, %v705_v24  ;;  %v551_v25 = vsub.f32 0.0, %v535_v38 }
 0x12c   : > { %1183 = vpow2.f32 %v576_v10  ;;  %v1180_v48 = vpop.eup %1179  ;;  %vm708_vm11 = vcmp.lt.f32.partialorder %v707_v12, 0.0004427343  ;;  %v1630_v3 = vadd.f32 %v863_v20, %v862_v18  ;;  %v566_v27 = vmul.f32 1.442695, %v543_v52 }
 0x12d   : > { %v526_v31 = vand.u32 2147483647, %v1832_v43  ;;  %v501_v23 = vunpack.c.1.s8 %v1624_v39  ;;  %v703_v44 = vmul.f32 0.6931472, %v1180_v48  ;;  %v582_v8 = vmul.f32 1.442695, %v551_v25 }
 0x12e   : > { %v757_v32 = vmax.f32 %v741_v6, 0.0  ;;  %1185 = vpow2.f32 %v566_v27  ;;  %v534_v45 = vand.u32 2147483647, %v1833_v41  ;;  %v492_v14 = vunpack.c.0.s8 %v1462_v9 }
 0x12f   : > { %v542_v60 = vsub.f32 0.0, %v526_v31  ;;  %v709_v35 = vsel %vm708_vm11, %v706_v19, %v703_v44  ;;  %1187 = vpow2.f32 %v582_v8  ;;  %v517_v53 = vcvt.s32.f32 %v501_v23 }
 0x130   : > { %v773_v47 = vadd.f32 %v757_v32, %v709_v35  ;;  %v550_v26 = vsub.f32 0.0, %v534_v45  ;;  %v500_v34 = vunpack.c.0.s8 %v1624_v39  ;;  %v495_v11 = vunpack.c.3.s8 %v1462_v9 }
 0x131   : > { %v564_v59 = vmul.f32 1.442695, %v542_v60  ;;  %v503_v56 = vunpack.c.3.s8 %v1624_v39  ;;  %v494_v21 = vunpack.c.2.s8 %v1462_v9  ;;  %v1646_v57 = vcvt.s32.f32 %v492_v14 }
 0x132   : > { %v1182_v29 = vpop.eup %1181  ;;  %v805_v40 = vmul.f32 0.25, %v773_v47  ;;  %v580_v49 = vmul.f32 1.442695, %v550_v26  ;;  %v789_v54 = vadd.f32 %v1452_v0, %v773_v47  ;;  %v1650_v51 = vcvt.s32.f32 %v500_v34 }
 0x133   : > { %1189 = vpow2.f32 %v564_v59  ;;  %v620_v33 = vadd.f32 1.0, %v1182_v29  ;;  %v623_v12 = vmul.f32 -0.5, %v1182_v29  ;;  %v740_v24 = vsub.f32 0.0, %v1459_v5 }
 0x134   : > { %v821_v50 = vsub.f32 %v805_v40, %v1452_v0  ;;  %1191 = vpow2.f32 %v580_v49  ;;  %v1834_v0 = vld [vmem:[#allocation6_spill] sm:$0xff]  ;;  %v735_v55 = vsub.f32 0.0, %v1830_v13  ;;  %v626_v37 = vand.u32 2147483647, %v1182_v29 }
 0x135   : > { %1193 = vlog2.f32 %v620_v33  ;;  %v732_v63 = vsub.f32 0.0, %v1834_v0  ;;  %v1654_v28 = vcvt.s32.f32 %v495_v11  ;;  %v1656_v17 = vcvt.s32.f32 %v503_v56 }
 0x136   : > { %v1184_v46 = vpop.eup %1183  ;;  %v837_v58 = vmul.f32 %v821_v50, %v517_v53  ;;  %v624_v16 = vadd.f32 1.0, %v623_v12  ;;  %v1658_v18 = vcvt.s32.f32 %v494_v21  ;;  %v756_v27 = vmax.f32 %v740_v24, 0.0 }
 0x137   : > { %v692_v15 = vadd.f32 1.0, %v1184_v46  ;;  %v695_v22 = vmul.f32 -0.5, %v1184_v46  ;;  %v748_v52 = vmax.f32 %v732_v63, 0.0  ;;  %v698_v20 = vand.u32 2147483647, %v1184_v46 }
 0x138   : > { %v1641_v6 = vpop.eup %1185  ;;  %v1643_v7 = vadd.f32 %v837_v58, %v789_v54  ;;  %v751_v23 = vmax.f32 %v735_v55, 0.0  ;;  %v743_v44 = vsub.f32 0.0, %v1831_v4  ;;  %vm1662_vm12 = vcmp.lt.f32.partialorder %v626_v37, 0.0004427343 }
 0x139   : > { %1195 = vlog2.f32 %v692_v15  ;;  %v1188_v36 = vpop.eup %1187  ;;  %v647_v1 = vadd.f32 1.0, %v1641_v6  ;;  %v696_v38 = vadd.f32 1.0, %v695_v22  ;;  %v650_v31 = vmul.f32 -0.5, %v1641_v6 }
 0x13a   : > { %v719_v10 = vadd.f32 1.0, %v1188_v36  ;;  %v722_v19 = vmul.f32 -0.5, %v1188_v36  ;;  %v734_v60 = vsub.f32 0.0, %v1832_v43  ;;  %v625_v47 = vmul.f32 %v1182_v29, %v624_v16 }
 0x13b   : > { %1197 = vlog2.f32 %v647_v1  ;;  %v697_v59 = vmul.f32 %v1184_v46, %v696_v38  ;;  %vm1667_vm13 = vcmp.lt.f32.partialorder %v698_v20, 0.0004427343  ;;  %v725_v33 = vand.u32 2147483647, %v1188_v36 }
 0x13c   : > { %1199 = vlog2.f32 %v719_v10  ;;  %v723_v49 = vadd.f32 1.0, %v722_v19  ;;  %v651_v15 = vadd.f32 1.0, %v650_v31  ;;  %v653_v34 = vand.u32 2147483647, %v1641_v6 }
 0x13d   : > { %v1190_v9 = vpop.eup %1189  ;;  %v759_v29 = vmax.f32 %v743_v44, 0.0  ;;  %v742_v46 = vsub.f32 0.0, %v1833_v41  ;;  %v750_v22 = vmax.f32 %v734_v60, 0.0  ;;  %vm1677_vm14 = vcmp.lt.f32.partialorder %v725_v33, 0.0004427343 }
 0x13e   : > { %v638_v25 = vadd.f32 1.0, %v1190_v9  ;;  %v1192_v48 = vpop.eup %1191  ;;  %v641_v26 = vmul.f32 -0.5, %v1190_v9  ;;  %v644_v12 = vand.u32 2147483647, %v1190_v9  ;;  %v724_v24 = vmul.f32 %v1188_v36, %v723_v49 }
 0x13f   : > { %v1194_v8 = vpop.eup %1193  ;;  %v710_v45 = vadd.f32 1.0, %v1192_v48  ;;  %v713_v54 = vmul.f32 -0.5, %v1192_v48  ;;  %v652_v16 = vmul.f32 %v1641_v6, %v651_v15  ;;  %vm654_vm15 = vcmp.lt.f32.partialorder %v653_v34, 0.0004427343 }
 0x140   : > { %1201 = vlog2.f32 %v638_v25  ;;  %v622_v35 = vmul.f32 0.6931472, %v1194_v8  ;;  %v642_v56 = vadd.f32 1.0, %v641_v26  ;;  %vm1684_vm0 = vcmp.lt.f32.partialorder %v644_v12, 0.0004427343 }
 0x141   : > { %1203 = vlog2.f32 %v710_v45  ;;  %v714_v38 = vadd.f32 1.0, %v713_v54  ;;  %v502_v33 = vunpack.c.2.s8 %v1624_v39  ;;  %v758_v34 = vmax.f32 %v742_v46, 0.0 }
 0x142   : > { %v628_v50 = vsel %vm1662_vm12, %v625_v47, %v622_v35 }
 0x143   : > { %v1196_v53 = vpop.eup %1195  ;;  %v764_v58 = vadd.f32 %v748_v52, %v628_v50  ;;  %v716_v52 = vand.u32 2147483647, %v1192_v48  ;;  %v518_v55 = vcvt.s32.f32 %v502_v33 }
 0x144   : > { %v694_v14 = vmul.f32 0.6931472, %v1196_v53 }
 0x145   : > { %v1198_v21 = vpop.eup %1197  ;;  %v796_v63 = vmul.f32 0.25, %v764_v58  ;;  %v780_v31 = vadd.f32 %v764_v58, %v1834_v0  ;;  %vm1692_vm2 = vcmp.lt.f32.partialorder %v716_v52, 0.0004427343 }
 0x146   : > { %v700_v11 = vsel %vm1667_vm13, %v697_v59, %v694_v14  ;;  %v1200_v10 = vpop.eup %1199  ;;  %v649_v37 = vmul.f32 0.6931472, %v1198_v21  ;;  %v715_v59 = vmul.f32 %v1192_v48, %v714_v38 }
 0x147   : > { %v772_v1 = vadd.f32 %v756_v27, %v700_v11  ;;  %v812_v20 = vsub.f32 %v796_v63, %v1834_v0  ;;  %v721_v25 = vmul.f32 0.6931472, %v1200_v10  ;;  %v643_v27 = vmul.f32 %v1190_v9, %v642_v56 }
 0x148   : > { %v655_v44 = vsel %vm654_vm15, %v652_v16, %v649_v37 }
 0x149   : > { %v804_v19 = vmul.f32 0.25, %v772_v1  ;;  %v828_v32 = vmul.f32 %v812_v20, %v1646_v57  ;;  %v767_v60 = vadd.f32 %v751_v23, %v655_v44  ;;  %v727_v45 = vsel %vm1677_vm14, %v724_v24, %v721_v25 }
 0x14a   : > { %v1202_v8 = vpop.eup %1201  ;;  %v775_v35 = vadd.f32 %v759_v29, %v727_v45  ;;  %v788_v53 = vadd.f32 %v772_v1, %v1459_v5  ;;  %v867_v29 = vsel %vm270_vm1, %v1627_v61, 0.0  ;;  %v879_v44 = vsel %vm270_vm1, %v1597_v2, 0.0 }
 0x14b   : > { %v820_v6 = vsub.f32 %v804_v19, %v1459_v5  ;;  %v640_v47 = vmul.f32 0.6931472, %v1202_v8  ;;  %v1204_v9 = vpop.eup %1203  ;;  %v844_v26 = vadd.f32 %v828_v32, %v780_v31  ;;  %v799_v57 = vmul.f32 0.25, %v767_v60 }
 0x14c   : > { %v807_v49 = vmul.f32 0.25, %v775_v35  ;;  %v712_v50 = vmul.f32 0.6931472, %v1204_v9  ;;  %v783_v39 = vadd.f32 %v1830_v13, %v767_v60  ;;  %v791_v12 = vadd.f32 %v1831_v4, %v775_v35  ;;  %v856_v60 = vld [vmem:[%s1395_s11] sm:$0xff] }
 0x14d   : > { %v836_v40 = vmul.f32 %v820_v6, %v1650_v51  ;;  %v646_v23 = vsel %vm1684_vm0, %v643_v27, %v640_v47  ;;  %v865_v48 = vsel %vm270_vm1, %v844_v26, 0.0  ;;  %v815_v15 = vsub.f32 %v799_v57, %v1830_v13 }
 0x14e   : > { %v766_v54 = vadd.f32 %v750_v22, %v646_v23  ;;  %v866_v58 = vadd.f32 %v865_v48, %v1630_v3  ;;  %v823_v5 = vsub.f32 %v807_v49, %v1831_v4  ;;  %v718_v51 = vsel %vm1692_vm2, %v715_v59, %v712_v50 }
 0x14f   : > { %v852_v14 = vadd.f32 %v836_v40, %v788_v53  ;;  %v831_v11 = vmul.f32 %v815_v15, %v1654_v28  ;;  %v774_v3 = vadd.f32 %v758_v34, %v718_v51  ;;  %v873_v19 = vsel %vm270_vm1, %v1586_v30, 0.0 }
 0x150   : > { %v798_v56 = vmul.f32 0.25, %v766_v54  ;;  %v839_v22 = vmul.f32 %v823_v5, %v1656_v17  ;;  %v868_v21 = vadd.f32 %v867_v29, %v866_v58  ;;  %v782_v10 = vadd.f32 %v766_v54, %v1832_v43 }
 0x151   : > { %v847_v63 = vadd.f32 %v831_v11, %v783_v39  ;;  %v806_v46 = vmul.f32 0.25, %v774_v3  ;;  %v790_v37 = vadd.f32 %v774_v3, %v1833_v41  ;;  %v881_v36 = vsel %vm270_vm1, %v852_v14, 0.0 }
 0x152   : > { %v814_v1 = vsub.f32 %v798_v56, %v1832_v43  ;;  %v855_v24 = vadd.f32 %v839_v22, %v791_v12  ;;  %v883_v8 = vsel %vm270_vm1, %v1643_v7, 0.0 }
 0x153   : > { %v822_v13 = vsub.f32 %v806_v46, %v1833_v41  ;;  %v871_v52 = vsel %vm270_vm1, %v847_v63, 0.0  ;;  %v877_v41 = vsel %vm270_vm1, %v1621_v62, 0.0 }
 0x154   : > { %v830_v61 = vmul.f32 %v814_v1, %v1658_v18  ;;  %v875_v18 = vsel %vm270_vm1, %v1575_v42, 0.0  ;;  %v887_v62 = vsel %vm270_vm1, %v855_v24, 0.0 }
 0x155   : > { %v838_v4 = vmul.f32 %v822_v13, %v518_v55 }
 0x156   : > { %v846_v28 = vadd.f32 %v830_v61, %v782_v10 }
 0x157   : > { %v854_v38 = vadd.f32 %v838_v4, %v790_v37 }
 0x158   : > { %v869_v17 = vsel %vm270_vm1, %v846_v28, 0.0 }
 0x159   : > { %v870_v16 = vadd.f32 %v869_v17, %v868_v21  ;;  %v885_v42 = vsel %vm270_vm1, %v854_v38, 0.0 }
 0x15b   : > { %v872_v20 = vadd.f32 %v871_v52, %v870_v16 }
 0x15d   : > { %v874_v43 = vadd.f32 %v873_v19, %v872_v20 }
 0x15f   : > { %v876_v25 = vadd.f32 %v875_v18, %v874_v43 }
 0x161   : > { %v878_v31 = vadd.f32 %v877_v41, %v876_v25 }
 0x163   : > { %v880_v27 = vadd.f32 %v879_v44, %v878_v31 }
 0x165   : > { %v882_v30 = vadd.f32 %v881_v36, %v880_v27 }
 0x167   : > { %v884_v32 = vadd.f32 %v883_v8, %v882_v30 }
 0x169   : > { %v886_v6 = vadd.f32 %v885_v42, %v884_v32 }
 0x16b   : > { %v888_v2 = vadd.f32 %v887_v62, %v886_v6 }
 0x16d   : > { %v889_v45 = vadd.f32 %v888_v2, %v856_v60 }
 0x16f   : > { %890 = vst.msk [vmem:[%s1395_s11] sm:$0xff] %vm270_vm1, %v889_v45 }
 0x170   : > { %1218 = shalt.err (!%p1215_p5)
}
 0x171   : > { %s1219_s7 = scalar_lea.hbm %s1739_s29, 128  ;;  %s1223_s10 = scalar_lea.hbm %s1793_s3, 256 }
 0x172   : > { %p1220_p6 = scmp.ne.s32.totalorder %s1739_s29, %s1219_s7  ;;  %p1224_p10 = scmp.lt.u32.totalorder %s1739_s29, %s1793_s3 }
 0x173   : > { %p1225_p11 = scmp.lt.u32.totalorder %s1223_s10, %s1219_s7  ;;  %p1227_p13 = scmp.lt.u32.totalorder %s1219_s7, %s1739_s29 }
 0x174   : > { %p1221_p7 = pnand %p1220_p6, %p1347_p4 }
 0x175   : > { %p1226_p12 = por %p1225_p11, %p1224_p10 }
 0x176   : > { %p1222_p9 = pneg %p1221_p7 }
 0x177   : > { %p1228_p0 = por %p1227_p13, %p1226_p12 }
 0x179   : > { %p1229_p1 = pnand %p1228_p0, %p1222_p9 }
 0x17b   : > { %1232 = shalt.err (!%p1229_p1)
}
 0x17c   : > { %1085 = dma.vmem_to_hbm [thread:$0]  (%p1347_p4), %s1741_s26, 128, %s1739_s29, %s892_s30  }
 0x17d PF: > { %p1091_p2 = scmp.ge.s32.totalorder %s1283_s17, 2  ;;  %s917_s19 = sand.u32 1, %s1263_s12  }
 0x17e   : > { %s918_s21 = scalar_lea.sflag [#allocation3], %s917_s19 }
 0x17f   : > { %p1088_p3 = pnand %p1091_p2, %p1354_p8 }
 0x181   : > { %1258 = dma.done.wait (!%p1088_p3), %s918_s21, 128  }
 0x182   : > { %1260 = vsyncadd (!%p1088_p3), %s918_s21, 4294967168  ;;  %s16_s17 = sadd.s32 1, %s1283_s17   ;;  %s1845_s12 = smov %s1267_s13 }
 0x183   : > { %p13_p5 = scmp.ge.s32.totalorder %s16_s17, 4   ;;  %s1846_s13 = smov %s1271_s14 }
 0x184   : > { %s1847_s14 = smov %s1360_s25  ;;  %s1848_s15 = smov %s1279_s16 }
 0x185   : > { %s1849_s16 = smov %s1851_s20  ;;  %15 = sbr.rel (!%p13_p5) target bundleno = 4 (0x4), region = 74 }
 0x18c   :  { %923 = vsyncpa [#allocation3], 1 }
 0x18d   :  { %925 = vsyncpa [#allocation3 + $0x1], 1 }

</bundles_post_ra>
